<compile_context>
chip_gen: v7x
topology: tpu7x:2x2x1
jax: 0.10.0
libtpu: 0.0.40
codegen_flags: <defaults>
</compile_context>

<pallas_src>
import functools

import jax
import jax.numpy as jnp
from jax.experimental import pallas as pl
from jax.experimental.pallas import tpu as pltpu


def _round_up(n, m):
    return (n + m - 1) // m * m


def _sigmoid(x):
    # Stable sigmoid on the EUP: sigmoid(x) = 0.5 * (tanh(x/2) + 1).
    return 0.5 * (jnp.tanh(0.5 * x) + 1.0)


def _psa_kernel(x_ref,
                wf_ref, bf_ref,          # fused [ch_wv; sp_wv; sp_wq; ch_wq], 8-row-aligned segments
                wz_ref, bz_ref,          # ch_wz  (C_p, C/2), (C_p, 1)
                lng_ref, lnb_ref,        # LayerNorm gamma/beta, (C_p, 1)
                o_ref,
                *, c, c2, seg, hw):
    bt, c_p, hw_p = x_ref.shape

    wf = wf_ref[...]                      # bf16 (n_out_p, c_p)
    bf = bf_ref[...]                      # f32  (n_out_p, 1)
    wz = wz_ref[...]                      # f32  (c_p, c2)
    bz = bz_ref[...]
    lng = lng_ref[...]
    lnb = lnb_ref[...]

    need_hw_mask = hw != hw_p             # static (trace-time) decisions
    need_c_mask = c != c_p
    if need_hw_mask:
        hw_mask = jax.lax.broadcasted_iota(jnp.int32, (1, hw_p), 1) < hw
    if need_c_mask:
        c_mask = jax.lax.broadcasted_iota(jnp.int32, (c_p, 1), 0) < c

    # Static unroll over the (small) batch tile: each iteration is pure 2-D.
    for bb in range(bt):
        x = x_ref[bb]                                              # (c_p, hw_p) f32

        # ---- single fused 1x1-conv matmul: (n_out_p, c_p) @ (c_p, hw_p) ----
        fused = jnp.dot(wf, x.astype(jnp.bfloat16),
                        preferred_element_type=jnp.float32) + bf   # (n_out_p, hw_p)

        # 8-sublane-aligned segment starts (0, seg, 2*seg, 3*seg): cheap slices.
        ch_wv = fused[0:c2, :]                                     # (c2, hw_p)
        sp_wv = fused[seg:seg + c2, :]                             # (c2, hw_p)
        sp_wq = fused[2 * seg:2 * seg + c2, :]                     # (c2, hw_p)
        ch_wq = fused[3 * seg:3 * seg + 1, :]                      # (1,  hw_p)

        # ---------------- channel-only branch ----------------
        # softmax over HW (lane axis); mask out padded HW columns if any.
        if need_hw_mask:
            ch_wq = jnp.where(hw_mask, ch_wq, -3.0e38)
        ch_wq = ch_wq - jnp.max(ch_wq, axis=-1, keepdims=True)
        e = jnp.exp(ch_wq)
        wq_sm = e * pl.reciprocal(jnp.sum(e, axis=-1, keepdims=True), approx=True)

        # channel_wz = channel_wv @ softmax(channel_wq) -> (c2, 1)
        z = jnp.sum(ch_wv * wq_sm, axis=-1, keepdims=True)

        # ch_wz 1x1 conv on the (1,1) spatial tensor (tiny matvec, fp32).
        z2 = jnp.dot(wz, z, preferred_element_type=jnp.float32) + bz   # (c_p, 1)

        # LayerNorm over the (valid) channel axis (biased variance, eps=1e-5).
        # Padded z2 rows are exactly 0 (zero weight rows / zero bias), so the
        # sum already equals the sum over valid channels.
        mean = jnp.sum(z2, axis=0, keepdims=True) * (1.0 / c)
        diff = z2 - mean
        if need_c_mask:
            diff = jnp.where(c_mask, diff, 0.0)
        var = jnp.sum(diff * diff, axis=0, keepdims=True) * (1.0 / c)
        ln = (z2 - mean) * jax.lax.rsqrt(var + 1e-5) * lng + lnb
        channel_weight = _sigmoid(ln)                                   # (c_p, 1)

        # ---------------- spatial-only branch ----------------
        if need_hw_mask:
            sq = jnp.sum(jnp.where(hw_mask, sp_wq, 0.0),
                         axis=-1, keepdims=True) * (1.0 / hw)           # AdaptiveAvgPool
        else:
            sq = jnp.mean(sp_wq, axis=-1, keepdims=True)                # (c2, 1)
        sq = sq - jnp.max(sq, axis=0, keepdims=True)
        es = jnp.exp(sq)
        sq_sm = es * pl.reciprocal(jnp.sum(es, axis=0, keepdims=True), approx=True)

        # spatial_wz = softmax(spatial_wq) @ spatial_wv -> (1, hw_p)
        sp_wz = jnp.sum(sp_wv * sq_sm, axis=0, keepdims=True)
        spatial_weight = _sigmoid(sp_wz)                                # (1, hw_p)

        # out = channel_weight*x + spatial_weight*x = x * (cw + sw)
        # Padded x rows/cols are zero, so padded outputs are zero (sliced away).
        o_ref[bb] = (x * (channel_weight + spatial_weight)).astype(o_ref.dtype)


def pack_params(params):
    """One-time packing of kernel-ready weights (call once, reuse across calls).

    1x1-conv weights are (C_out, C_in) matrices (== PyTorch weight[:, :, 0, 0]).
    Builds the fused x-consuming conv weight with 8-row-aligned segments and
    zero-pads the channel dimension to a multiple of 8."""
    c2, c = params["w_chwv"].shape
    c_p = _round_up(c, 8)
    seg = _round_up(c2, 8)
    n_out_p = 3 * seg + 8

    wf = jnp.zeros((n_out_p, c_p), jnp.float32)
    bf = jnp.zeros((n_out_p, 1), jnp.float32)

    def put(wf, bf, row, wmat, bcol):
        r = wmat.shape[0]
        wf = wf.at[row:row + r, :c].set(wmat)
        bf = bf.at[row:row + r, :].set(bcol)
        return wf, bf

    wf, bf = put(wf, bf, 0 * seg, params["w_chwv"], params["b_chwv"])
    wf, bf = put(wf, bf, 1 * seg, params["w_spwv"], params["b_spwv"])
    wf, bf = put(wf, bf, 2 * seg, params["w_spwq"], params["b_spwq"])
    wf, bf = put(wf, bf, 3 * seg, params["w_chwq"], params["b_chwq"])

    wz = jnp.zeros((c_p, c2), jnp.float32).at[:c].set(params["w_chwz"])
    bz = jnp.zeros((c_p, 1), jnp.float32).at[:c].set(params["b_chwz"])
    lng = jnp.ones((c_p, 1), jnp.float32).at[:c].set(params["ln_g"])
    lnb = jnp.zeros((c_p, 1), jnp.float32).at[:c].set(params["ln_b"])

    return {
        "channel": c,
        "w_fused": wf.astype(jnp.bfloat16),   # MXU operand
        "b_fused": bf,                        # fp32 bias
        "w_chwz": wz, "b_chwz": bz,
        "ln_g": lng, "ln_b": lnb,
    }


def _pick_bt(b, fit):
    """Largest divisor of b that fits VMEM and leaves >= 2 grid steps (v7x)."""
    cap = min(fit, max(1, b // 2)) if b >= 2 else 1
    bt = 1
    for d in range(1, b + 1):
        if b % d == 0 and d <= cap:
            bt = d
    return bt


def parallel_polarized_self_attention(x_nchw, kp):
    """x_nchw: (B, C, H, W) float32; kp: output of pack_params(). Returns (B, C, H, W)."""
    b, c, h, w = x_nchw.shape
    assert kp["channel"] == c
    hw = h * w
    c2 = c // 2
    c_p = _round_up(c, 8)
    hw_p = _round_up(hw, 128)
    seg = _round_up(c2, 8)
    n_out_p = 3 * seg + 8
    assert kp["w_fused"].shape == (n_out_p, c_p)

    # Pure reshape (no transpose): NCHW -> (B, C, HW); pad to dense tiles only
    # if the shape requires it (no-op for the common aligned case).
    x = x_nchw.reshape(b, c, hw)
    if c_p != c or hw_p != hw:
        x = jnp.pad(x, ((0, 0), (0, c_p - c), (0, hw_p - hw)))

    # VMEM budget: 75% of the physical per-core capacity (never exceeds v7x's
    # 64 MiB), with a conservative fallback if the query is unavailable.
    try:
        vmem_phys = int(pltpu.get_tpu_info().vmem_capacity_bytes)
    except Exception:
        vmem_phys = 64 * 1024 * 1024
    budget = int(vmem_phys * 0.75)

    # Rough per-batch-element VMEM footprint (fp32): double-buffered in/out
    # blocks + fused matmul slab + element-wise temporaries.
    per_elem = 4 * hw_p * (4 * c_p + n_out_p + c_p + 2 * seg)
    bt_fit = max(1, budget // max(per_elem, 1))
    bt = _pick_bt(b, bt_fit)

    full = lambda shp: pl.BlockSpec(shp, lambda i: (0,) * len(shp))

    kernel = pl.pallas_call(
        functools.partial(_psa_kernel, c=c, c2=c2, seg=seg, hw=hw),
        out_shape=jax.ShapeDtypeStruct((b, c_p, hw_p), x.dtype),
        grid_spec=pltpu.PrefetchScalarGridSpec(
            num_scalar_prefetch=0,
            grid=(b // bt,),
            in_specs=[
                pl.BlockSpec((bt, c_p, hw_p), lambda i: (i, 0, 0)),   # x
                full((n_out_p, c_p)), full((n_out_p, 1)),             # fused conv W, b
                full((c_p, c2)), full((c_p, 1)),                      # ch_wz W, b
                full((c_p, 1)), full((c_p, 1)),                       # LayerNorm g, b
            ],
            out_specs=pl.BlockSpec((bt, c_p, hw_p), lambda i: (i, 0, 0)),
        ),
        compiler_params=pltpu.CompilerParams(
            dimension_semantics=("parallel",),
            vmem_limit_bytes=budget),
    )

    out = kernel(
        x,
        kp["w_fused"], kp["b_fused"],
        kp["w_chwz"], kp["b_chwz"],
        kp["ln_g"], kp["ln_b"],
    )
    if c_p != c or hw_p != hw:
        out = out[:, :c, :hw]
    return out.reshape(b, c, h, w)


def init_params(key, channel):
    """Deterministic synthetic parameters.  1x1-conv weights are stored as
    (C_out, C_in) matrices (== PyTorch conv weight[:, :, 0, 0], no transpose);
    biases / LayerNorm params are stored as (C_out, 1) columns."""
    c, c2 = channel, channel // 2
    ks = jax.random.split(key, 10)
    n = lambda k, shp: jax.random.normal(k, shp, jnp.float32) * 0.1
    return {
        "w_chwv": n(ks[0], (c2, c)), "b_chwv": n(ks[1], (c2, 1)),
        "w_chwq": n(ks[2], (1, c)),  "b_chwq": n(ks[3], (1, 1)),
        "w_chwz": n(ks[4], (c, c2)), "b_chwz": n(ks[5], (c, 1)),
        "ln_g": jnp.ones((c, 1), jnp.float32),    # LayerNorm init: weight=1
        "ln_b": jnp.zeros((c, 1), jnp.float32),   #                 bias=0
        "w_spwv": n(ks[6], (c2, c)), "b_spwv": n(ks[7], (c2, 1)),
        "w_spwq": n(ks[8], (c2, c)), "b_spwq": n(ks[9], (c2, 1)),
    }


def _reference(x_nchw, p):
    """Pure-JAX reference of the PyTorch forward.  Mirrors the kernel's bf16
    MXU operands for the four fused 1x1 convs (fp32 accumulation) so the
    comparison is tight; everything else is plain fp32."""
    b, c, h, w = x_nchw.shape
    x = x_nchw.reshape(b, c, h * w).astype(jnp.float32)     # (B, C, HW)
    xb = x.astype(jnp.bfloat16)

    conv = lambda wt: jnp.einsum("oc,bcs->bos", wt.astype(jnp.bfloat16), xb,
                                 preferred_element_type=jnp.float32)

    # channel branch
    ch_wv = conv(p["w_chwv"]) + p["b_chwv"]                  # (B, C/2, HW)
    ch_wq = conv(p["w_chwq"]) + p["b_chwq"]                  # (B, 1, HW)
    wq_sm = jax.nn.softmax(ch_wq, axis=-1)                   # softmax over HW
    z = jnp.sum(ch_wv * wq_sm, axis=-1, keepdims=True)       # (B, C/2, 1)
    z2 = jnp.einsum("oc,bcs->bos", p["w_chwz"], z) + p["b_chwz"]   # (B, C, 1)
    mean = jnp.mean(z2, axis=1, keepdims=True)
    var = jnp.mean((z2 - mean) ** 2, axis=1, keepdims=True)
    cw = jax.nn.sigmoid((z2 - mean) / jnp.sqrt(var + 1e-5) * p["ln_g"]
                        + p["ln_b"])                         # (B, C, 1)
    channel_out = cw * x

    # spatial branch (reads x — parallel variant)
    sp_wv = conv(p["w_spwv"]) + p["b_spwv"]                  # (B, C/2, HW)
    sp_wq = conv(p["w_spwq"]) + p["b_spwq"]                  # (B, C/2, HW)
    sq = jnp.mean(sp_wq, axis=-1, keepdims=True)             # adaptive avg pool
    sq_sm = jax.nn.softmax(sq, axis=1)                       # softmax over C/2
    sp_wz = jnp.sum(sp_wv * sq_sm, axis=1, keepdims=True)    # (B, 1, HW)
    sw = jax.nn.sigmoid(sp_wz)
    spatial_out = sw * x

    return (channel_out + spatial_out).reshape(b, c, h, w)


if __name__ == "__main__":
    B, C, H, W = 2, 4, 16, 16
    key = jax.random.PRNGKey(0)
    kx, kp_key = jax.random.split(key)
    x = jax.random.normal(kx, (B, C, H, W), jnp.float32)
    params = init_params(kp_key, C)
    packed = pack_params(params)          # one-time weight fusion / padding / bf16 cast

    out = parallel_polarized_self_attention(x, packed)
    out = jax.block_until_ready(out)

    ref = _reference(x, params)
    assert out.shape == (B, C, H, W)
    # Tolerance covers pl.reciprocal(approx=True) and accumulation-order noise.
    assert jnp.allclose(out, ref, atol=2e-2, rtol=2e-2), "mismatch vs reference"
    print("KERNEL_OK")
</pallas_src>

<mosaic_0001>
module attributes {stable_mosaic.version = 11 : i64} {
  func.func @_psa_kernel(%arg0: i32, %arg1: memref<1x8x256xf32, #tpu.memory_space<vmem>>, %arg2: memref<32x8xbf16, #tpu.memory_space<vmem>>, %arg3: memref<32x1xf32, #tpu.memory_space<vmem>>, %arg4: memref<8x2xf32, #tpu.memory_space<vmem>>, %arg5: memref<8x1xf32, #tpu.memory_space<vmem>>, %arg6: memref<8x1xf32, #tpu.memory_space<vmem>>, %arg7: memref<8x1xf32, #tpu.memory_space<vmem>>, %arg8: memref<1x8x256xf32, #tpu.memory_space<vmem>>) attributes {dimension_semantics = [#tpu.dimension_semantics<parallel>], iteration_bounds = array<i64: 2>, scalar_prefetch = 0 : i64, scratch_operands = 0 : i64, tpu.core_type = #tpu.core_type<tc>, window_params = [{transform_indices = @transform_0, window_bounds = array<i64: 1, 8, 256>}, {pipeline_mode = #tpu.pipeline_mode<synchronous>, transform_indices = @transform_1, window_bounds = array<i64: 32, 8>}, {pipeline_mode = #tpu.pipeline_mode<synchronous>, transform_indices = @transform_2, window_bounds = array<i64: 32, 1>}, {pipeline_mode = #tpu.pipeline_mode<synchronous>, transform_indices = @transform_3, window_bounds = array<i64: 8, 2>}, {pipeline_mode = #tpu.pipeline_mode<synchronous>, transform_indices = @transform_4, window_bounds = array<i64: 8, 1>}, {pipeline_mode = #tpu.pipeline_mode<synchronous>, transform_indices = @transform_5, window_bounds = array<i64: 8, 1>}, {pipeline_mode = #tpu.pipeline_mode<synchronous>, transform_indices = @transform_6, window_bounds = array<i64: 8, 1>}, {transform_indices = @transform_7, window_bounds = array<i64: 1, 8, 256>}]} {
    %c0 = arith.constant 0 : index
    %c0_0 = arith.constant 0 : index
    %0 = vector.load %arg2[%c0, %c0_0] : memref<32x8xbf16, #tpu.memory_space<vmem>>, vector<32x8xbf16>
    %c0_1 = arith.constant 0 : index
    %c0_2 = arith.constant 0 : index
    %1 = vector.load %arg3[%c0_1, %c0_2] : memref<32x1xf32, #tpu.memory_space<vmem>>, vector<32x1xf32>
    %c0_3 = arith.constant 0 : index
    %c0_4 = arith.constant 0 : index
    %2 = vector.load %arg4[%c0_3, %c0_4] : memref<8x2xf32, #tpu.memory_space<vmem>>, vector<8x2xf32>
    %c0_5 = arith.constant 0 : index
    %c0_6 = arith.constant 0 : index
    %3 = vector.load %arg5[%c0_5, %c0_6] : memref<8x1xf32, #tpu.memory_space<vmem>>, vector<8x1xf32>
    %c0_7 = arith.constant 0 : index
    %c0_8 = arith.constant 0 : index
    %4 = vector.load %arg6[%c0_7, %c0_8] : memref<8x1xf32, #tpu.memory_space<vmem>>, vector<8x1xf32>
    %c0_9 = arith.constant 0 : index
    %c0_10 = arith.constant 0 : index
    %5 = vector.load %arg7[%c0_9, %c0_10] : memref<8x1xf32, #tpu.memory_space<vmem>>, vector<8x1xf32>
    %6 = tpu.iota {dimensions = array<i32: 0>} : vector<8x1xi32>
    %c4_i32 = arith.constant 4 : i32
    %7 = vector.broadcast %c4_i32 : i32 to vector<8x1xi32>
    %8 = arith.cmpi slt, %6, %7 : vector<8x1xi32>
    %c0_11 = arith.constant 0 : index
    %c0_12 = arith.constant 0 : index
    %c0_13 = arith.constant 0 : index
    %9 = vector.load %arg1[%c0_11, %c0_12, %c0_13] : memref<1x8x256xf32, #tpu.memory_space<vmem>>, vector<1x8x256xf32>
    %10 = vector.shape_cast %9 : vector<1x8x256xf32> to vector<8x256xf32>
    %11 = arith.truncf %10 : vector<8x256xf32> to vector<8x256xbf16>
    %cst = arith.constant dense<0.000000e+00> : vector<32x256xf32>
    %12 = tpu.matmul %0, %11, %cst {dimension_numbers = #tpu.dot_dimension_numbers<[1], [0], [0], [1], [0, 0, 1, 1], [], []>} : vector<32x8xbf16>, vector<8x256xbf16>, vector<32x256xf32> -> vector<32x256xf32>
    %13 = vector.broadcast %1 : vector<32x1xf32> to vector<32x256xf32>
    %14 = arith.addf %12, %13 : vector<32x256xf32>
    %15 = vector.extract_strided_slice %14 {offsets = [0, 0], sizes = [2, 256], strides = [1, 1]} : vector<32x256xf32> to vector<2x256xf32>
    %16 = vector.extract_strided_slice %14 {offsets = [8, 0], sizes = [2, 256], strides = [1, 1]} : vector<32x256xf32> to vector<2x256xf32>
    %17 = vector.extract_strided_slice %14 {offsets = [16, 0], sizes = [2, 256], strides = [1, 1]} : vector<32x256xf32> to vector<2x256xf32>
    %18 = vector.extract_strided_slice %14 {offsets = [24, 0], sizes = [1, 256], strides = [1, 1]} : vector<32x256xf32> to vector<1x256xf32>
    %cst_14 = arith.constant dense<0xFF800000> : vector<1xf32>
    %19 = vector.multi_reduction <maximumf>, %18, %cst_14 [1] : vector<1x256xf32> to vector<1xf32>
    %20 = vector.shape_cast %19 : vector<1xf32> to vector<1x1xf32>
    %21 = vector.broadcast %20 : vector<1x1xf32> to vector<1x256xf32>
    %22 = arith.subf %18, %21 : vector<1x256xf32>
    %23 = math.exp %22 : vector<1x256xf32>
    %cst_15 = arith.constant dense<0.000000e+00> : vector<1xf32>
    %24 = vector.multi_reduction <add>, %23, %cst_15 [1] : vector<1x256xf32> to vector<1xf32>
    %25 = vector.shape_cast %24 : vector<1xf32> to vector<1x1xf32>
    %26 = tpu.reciprocal %25 {approx = true} : vector<1x1xf32> -> vector<1x1xf32>
    %27 = vector.broadcast %26 : vector<1x1xf32> to vector<1x256xf32>
    %28 = arith.mulf %23, %27 : vector<1x256xf32>
    %29 = vector.broadcast %28 : vector<1x256xf32> to vector<2x256xf32>
    %30 = arith.mulf %15, %29 : vector<2x256xf32>
    %cst_16 = arith.constant dense<0.000000e+00> : vector<2xf32>
    %31 = vector.multi_reduction <add>, %30, %cst_16 [1] : vector<2x256xf32> to vector<2xf32>
    %32 = vector.shape_cast %31 : vector<2xf32> to vector<2x1xf32>
    %cst_17 = arith.constant dense<0.000000e+00> : vector<8x1xf32>
    %33 = tpu.matmul %2, %32, %cst_17 {dimension_numbers = #tpu.dot_dimension_numbers<[1], [0], [0], [1], [0, 0, 1, 1], [], []>} : vector<8x2xf32>, vector<2x1xf32>, vector<8x1xf32> -> vector<8x1xf32>
    %34 = arith.addf %33, %3 : vector<8x1xf32>
    %cst_18 = arith.constant dense<0.000000e+00> : vector<1xf32>
    %35 = vector.multi_reduction <add>, %34, %cst_18 [0] : vector<8x1xf32> to vector<1xf32>
    %36 = vector.shape_cast %35 : vector<1xf32> to vector<1x1xf32>
    %cst_19 = arith.constant 2.500000e-01 : f32
    %37 = vector.broadcast %cst_19 : f32 to vector<1x1xf32>
    %38 = arith.mulf %36, %37 : vector<1x1xf32>
    %39 = vector.broadcast %38 : vector<1x1xf32> to vector<8x1xf32>
    %40 = arith.subf %34, %39 : vector<8x1xf32>
    %cst_20 = arith.constant 0.000000e+00 : f32
    %41 = vector.broadcast %cst_20 : f32 to vector<8x1xf32>
    %42 = arith.select %8, %40, %41 : vector<8x1xi1>, vector<8x1xf32>
    %43 = arith.mulf %42, %42 : vector<8x1xf32>
    %cst_21 = arith.constant dense<0.000000e+00> : vector<1xf32>
    %44 = vector.multi_reduction <add>, %43, %cst_21 [0] : vector<8x1xf32> to vector<1xf32>
    %45 = vector.shape_cast %44 : vector<1xf32> to vector<1x1xf32>
    %cst_22 = arith.constant 2.500000e-01 : f32
    %46 = vector.broadcast %cst_22 : f32 to vector<1x1xf32>
    %47 = arith.mulf %45, %46 : vector<1x1xf32>
    %48 = vector.broadcast %38 : vector<1x1xf32> to vector<8x1xf32>
    %49 = arith.subf %34, %48 : vector<8x1xf32>
    %cst_23 = arith.constant 9.99999974E-6 : f32
    %50 = vector.broadcast %cst_23 : f32 to vector<1x1xf32>
    %51 = arith.addf %47, %50 : vector<1x1xf32>
    %52 = math.rsqrt %51 : vector<1x1xf32>
    %53 = vector.broadcast %52 : vector<1x1xf32> to vector<8x1xf32>
    %54 = arith.mulf %49, %53 : vector<8x1xf32>
    %55 = arith.mulf %54, %4 : vector<8x1xf32>
    %56 = arith.addf %55, %5 : vector<8x1xf32>
    %cst_24 = arith.constant 5.000000e-01 : f32
    %57 = vector.broadcast %cst_24 : f32 to vector<8x1xf32>
    %58 = arith.mulf %57, %56 : vector<8x1xf32>
    %59 = math.tanh %58 : vector<8x1xf32>
    %cst_25 = arith.constant 1.000000e+00 : f32
    %60 = vector.broadcast %cst_25 : f32 to vector<8x1xf32>
    %61 = arith.addf %59, %60 : vector<8x1xf32>
    %cst_26 = arith.constant 5.000000e-01 : f32
    %62 = vector.broadcast %cst_26 : f32 to vector<8x1xf32>
    %63 = arith.mulf %62, %61 : vector<8x1xf32>
    %cst_27 = arith.constant dense<0.000000e+00> : vector<2xf32>
    %64 = vector.multi_reduction <add>, %17, %cst_27 [1] : vector<2x256xf32> to vector<2xf32>
    %65 = vector.shape_cast %64 : vector<2xf32> to vector<2x1xf32>
    %cst_28 = arith.constant 2.560000e+02 : f32
    %66 = vector.broadcast %cst_28 : f32 to vector<2x1xf32>
    %67 = arith.divf %65, %66 : vector<2x1xf32>
    %cst_29 = arith.constant dense<0xFF800000> : vector<1xf32>
    %68 = vector.multi_reduction <maximumf>, %67, %cst_29 [0] : vector<2x1xf32> to vector<1xf32>
    %69 = vector.shape_cast %68 : vector<1xf32> to vector<1x1xf32>
    %70 = vector.broadcast %69 : vector<1x1xf32> to vector<2x1xf32>
    %71 = arith.subf %67, %70 : vector<2x1xf32>
    %72 = math.exp %71 : vector<2x1xf32>
    %cst_30 = arith.constant dense<0.000000e+00> : vector<1xf32>
    %73 = vector.multi_reduction <add>, %72, %cst_30 [0] : vector<2x1xf32> to vector<1xf32>
    %74 = vector.shape_cast %73 : vector<1xf32> to vector<1x1xf32>
    %75 = tpu.reciprocal %74 {approx = true} : vector<1x1xf32> -> vector<1x1xf32>
    %76 = vector.broadcast %75 : vector<1x1xf32> to vector<2x1xf32>
    %77 = arith.mulf %72, %76 : vector<2x1xf32>
    %78 = vector.broadcast %77 : vector<2x1xf32> to vector<2x256xf32>
    %79 = arith.mulf %16, %78 : vector<2x256xf32>
    %cst_31 = arith.constant dense<0.000000e+00> : vector<256xf32>
    %80 = vector.multi_reduction <add>, %79, %cst_31 [0] : vector<2x256xf32> to vector<256xf32>
    %81 = vector.shape_cast %80 : vector<256xf32> to vector<1x256xf32>
    %cst_32 = arith.constant 5.000000e-01 : f32
    %82 = vector.broadcast %cst_32 : f32 to vector<1x256xf32>
    %83 = arith.mulf %82, %81 : vector<1x256xf32>
    %84 = math.tanh %83 : vector<1x256xf32>
    %cst_33 = arith.constant 1.000000e+00 : f32
    %85 = vector.broadcast %cst_33 : f32 to vector<1x256xf32>
    %86 = arith.addf %84, %85 : vector<1x256xf32>
    %cst_34 = arith.constant 5.000000e-01 : f32
    %87 = vector.broadcast %cst_34 : f32 to vector<1x256xf32>
    %88 = arith.mulf %87, %86 : vector<1x256xf32>
    %89 = vector.broadcast %63 : vector<8x1xf32> to vector<8x256xf32>
    %90 = vector.broadcast %88 : vector<1x256xf32> to vector<8x256xf32>
    %91 = arith.addf %89, %90 : vector<8x256xf32>
    %92 = arith.mulf %10, %91 : vector<8x256xf32>
    %c0_35 = arith.constant 0 : index
    %c0_36 = arith.constant 0 : index
    %c0_37 = arith.constant 0 : index
    %93 = vector.load %arg8[%c0_35, %c0_36, %c0_37] : memref<1x8x256xf32, #tpu.memory_space<vmem>>, vector<1x8x256xf32>
    %94 = vector.shape_cast %93 : vector<1x8x256xf32> to vector<8x256xf32>
    %95 = vector.shape_cast %92 : vector<8x256xf32> to vector<1x8x256xf32>
    tpu.vector_store %arg8[%c0_35, %c0_36, %c0_37], %95 {strides = array<i32>} : memref<1x8x256xf32, #tpu.memory_space<vmem>>, vector<1x8x256xf32>,
    return
  }
  func.func @transform_0(%arg0: i32) -> (i32, i32, i32) {
    %c0_i32 = arith.constant 0 : i32
    %c0_i32_0 = arith.constant 0 : i32
    %c0_i32_1 = arith.constant 0 : i32
    return %arg0, %c0_i32, %c0_i32_0 : i32, i32, i32
  }
  func.func @transform_1(%arg0: i32) -> (i32, i32) {
    %c0_i32 = arith.constant 0 : i32
    %c0_i32_0 = arith.constant 0 : i32
    %c0_i32_1 = arith.constant 0 : i32
    return %c0_i32, %c0_i32_0 : i32, i32
  }
  func.func @transform_2(%arg0: i32) -> (i32, i32) {
    %c0_i32 = arith.constant 0 : i32
    %c0_i32_0 = arith.constant 0 : i32
    %c0_i32_1 = arith.constant 0 : i32
    return %c0_i32, %c0_i32_0 : i32, i32
  }
  func.func @transform_3(%arg0: i32) -> (i32, i32) {
    %c0_i32 = arith.constant 0 : i32
    %c0_i32_0 = arith.constant 0 : i32
    %c0_i32_1 = arith.constant 0 : i32
    return %c0_i32, %c0_i32_0 : i32, i32
  }
  func.func @transform_4(%arg0: i32) -> (i32, i32) {
    %c0_i32 = arith.constant 0 : i32
    %c0_i32_0 = arith.constant 0 : i32
    %c0_i32_1 = arith.constant 0 : i32
    return %c0_i32, %c0_i32_0 : i32, i32
  }
  func.func @transform_5(%arg0: i32) -> (i32, i32) {
    %c0_i32 = arith.constant 0 : i32
    %c0_i32_0 = arith.constant 0 : i32
    %c0_i32_1 = arith.constant 0 : i32
    return %c0_i32, %c0_i32_0 : i32, i32
  }
  func.func @transform_6(%arg0: i32) -> (i32, i32) {
    %c0_i32 = arith.constant 0 : i32
    %c0_i32_0 = arith.constant 0 : i32
    %c0_i32_1 = arith.constant 0 : i32
    return %c0_i32, %c0_i32_0 : i32, i32
  }
  func.func @transform_7(%arg0: i32) -> (i32, i32, i32) {
    %c0_i32 = arith.constant 0 : i32
    %c0_i32_0 = arith.constant 0 : i32
    %c0_i32_1 = arith.constant 0 : i32
    return %arg0, %c0_i32, %c0_i32_0 : i32, i32, i32
  }
}

</mosaic_0001>

<bundles_post_ra>
// kernel: tpu_custom_call.1
= control target key start
LH: loop header
LB: loop body
LE: loop exit
PB: predicated region body
PF: predicated region fallthrough
CT: control target
= control target key end

     0   :  { %12 = vsyncpa [#allocation3], 0  ;;  %s1032_s0 = inlined_call_operand.vmem [shape: f32[2,8,256], index: 0, kind: input, shape index: {}]   ;;  %s1033_s1 = inlined_call_operand.vmem [shape: bf16[32,8], index: 1, kind: input, shape index: {}]   ;;  %s1034_s2 = inlined_call_operand.vmem [shape: f32[32,1], index: 2, kind: input, shape index: {}]   ;;  %s1035_s3 = inlined_call_operand.vmem [shape: f32[8,2], index: 3, kind: input, shape index: {}]   ;;  %s1036_s4 = inlined_call_operand.vmem [shape: f32[8,1], index: 4, kind: input, shape index: {}]   ;;  %s1037_s5 = inlined_call_operand.vmem [shape: f32[8,1], index: 5, kind: input, shape index: {}]   ;;  %s1038_s6 = inlined_call_operand.vmem [shape: f32[8,1], index: 6, kind: input, shape index: {}]   ;;  %s1039_s7 = inlined_call_operand.hbm [shape: f32[2,8,256], index: 7, kind: output, shape index: {}]  }
   0x1   :  { %14 = vsyncpa [#allocation3 + $0x1], 0  ;;  %s873_s24 = smov 0   ;;  %s875_s25 = smov 0  }
   0x2   :  { %s877_s26 = smov 0   ;;  %s879_s27 = smov 0  }
   0x3 LB: > { %s894_s28 = sadd.s32 4294967295, %s827_s27   ;;  %s671_s29 = sadd.s32 4294967294, %s827_s27   ;;  %s827_s27 = sphi %s879_s27, %s1045_s27   ;;  %s823_s26 = sphi %s877_s26, %s1044_s26   ;;  %s819_s25 = sphi %s875_s25, %s1043_s25   ;;  %s815_s24 = sphi %s873_s24, %s1042_s24  }
   0x4   : > { %s898_s30 = sadd.s32 1, %s827_s27   ;;  %s179_s8 = sadd.s32 1, %s823_s26 }
   0x5   : > { %s176_s9 = ssub.s32 %s827_s27, %s898_s30  ;;  %p189_p0 = scmp.ne.s32.totalorder %s823_s26, %s819_s25 }
   0x6   : > { %p177_p1 = scmp.eq.s32.totalorder %s176_s9, 0  ;;  %p190_p2 = scmp.eq.s32.totalorder %s894_s28, 1 }
   0x7   : > { %p195_p3 = scmp.ne.s32.totalorder %s819_s25, %s815_s24  ;;  %p196_p4 = scmp.eq.s32.totalorder %s671_s29, 1 }
   0x8   : > { %s909_s10 = scalar_select %p177_p1, %s823_s26, %s179_s8  }
   0x9   : > { %p911_p5 = por %p190_p2, %p189_p0  ;;  %p915_p6 = por %p196_p4, %p195_p3 }
   0xa   : > { %p674_p7 = scmp.ge.s32.totalorder %s827_s27, 1  ;;  %p240_p8 = scmp.lt.s32.totalorder %s827_s27, 3 }
   0xc   : > { %p241_p9 = pnand %p674_p7, %p240_p8 }
   0xd   : > { %p272_p10 = scmp.lt.s32.totalorder (!%p241_p9), %s894_s28, 1  ;;  %v829_v0 = vmov (!%p241_p9), 0   ;;  %v285_v1 = vld [vmem:[%s1034_s2 + $0x18] sm:$0xff] (!%p241_p9)  ;;  %vm334_vm0 = vcmask (!%p241_p9), 1043456   ;;  %v745_v7 = vld [vmem:[%s1033_s1 + $0x8] sm:$0xff] (!%p241_p9)   ;;  %vm327_vm1 = vcmask (!%p241_p9), 64512   ;;  %v290_v43 = vlaneseq (!%p241_p9) }
   0xe   : > { %244 = sbr.rel (%p241_p9) target bundleno = 1149 (0x47d), region = 48  ;;  %383 = vmatprep.mubr.bf16.mxu1 (!%p241_p9), %v829_v0  ;;  %743 = vset.pattern.permute.xlu0 (!%p241_p9), %v829_v0  ;;  %v746_v8 = vld [vmem:[%s1033_s1] sm:$0xff] (!%p241_p9)   ;;  %vm394_vm2 = vcmask (!%p241_p9), 1040384   ;;  %v284_v19 = vld [vmem:[%s1034_s2 + $0x10] sm:$0xff] (!%p241_p9)  ;;  %vm424_vm3 = vcmask (!%p241_p9), 1041408   ;;  %v830_v41 = vmov (!%p241_p9), 0.0  }
   0xf   : > { %314 = vperm.xlu0 (!%p241_p9), %743, %v285_v1   ;;  %373 = vmatprep.mubr.bf16.mxu0 (!%p241_p9), %v829_v0  ;;  %v282_v36 = vld [vmem:[%s1034_s2] sm:$0xff] (!%p241_p9)  ;;  %v291_v44 = vshrl.u32 (!%p241_p9), %v290_v43, 7  ;;  %v283_v59 = vld [vmem:[%s1034_s2 + $0x8] sm:$0xff] (!%p241_p9)  ;;  %vm831_vm4 = vmmov (!%p241_p9), 0   ;;  %vm430_vm5 = vcmask (!%p241_p9), 15360   ;;  %vm507_vm6 = vcmask (!%p241_p9), 7168  }
  0x10   : > { %744 = vset.pattern.permute.xlu1 (!%p241_p9), %v829_v0  ;;  %v286_v60 = vld [vmem:[%s1035_s3] sm:$0xff] (!%p241_p9)  ;;  %s269_s29 = sand.u32 (!%p241_p9), 1, %s819_s25   ;;  %s691_s9 = sshll.u32 (!%p241_p9), %s894_s28, 8 }
  0x11   : > { %v416_v46 = vsub.s32 (!%p241_p9), 0, %v291_v44  ;;  %v287_v62 = vld [vmem:[%s1036_s4] sm:$0xff] (!%p241_p9)  ;;  %vm292_vm7 = vcmp.lt.s32.totalorder (!%p241_p9), %v291_v44, 4  ;;  %s675_s8 = sshll.u32 (!%p241_p9), %s269_s29, 4  ;;  %s990_s17 = scalar_lea.hbm (!%p241_p9), %s1039_s7, %s691_s9 }
  0x12   : > { %s271_s13 = scalar_lea.vmem (!%p241_p9), [#allocation2], %s675_s8 }
  0x13   : > { %s612_s14 = sshll.u32 (!%p241_p9), %s271_s13, 4  ;;  %s992_s14 = int_to_ptr.vmem [resolvable:$true] %s612_s14 }
  0x14   : > { %s765_s18 = scalar_lea.vmem (!%p241_p9), %s992_s14, 256 }
  0x15   : > { %s273_s15 = scalar_select %p272_p10, %s894_s28, 1 }
  0x16   : > { %s598_s28 = scalar_lea.sflag [#allocation3], %s269_s29  ;;  %p766_p11 = scmp.ne.s32.totalorder %s992_s14, %s765_s18 }
  0x17   : > { %s690_s16 = sshll.u32 %s273_s15, 4 }
  0x18   : > { %s276_s19 = scalar_lea.vmem %s1032_s0, %s690_s16  ;;  %p767_p12 = pnand %p766_p11, %p911_p5 }
  0x19   : > { %v929_v2 = vld [vmem:[%s276_s19 + $0x8] sm:$0xff]  ;;  %v931_v3 = vld [vmem:[%s276_s19] sm:$0xff]  ;;  %s832_s19 = smov [#allocation2]  }
  0x1a   : > { %v296_v4 = vpack.c.bf16 %v929_v2, %v929_v2  ;;  %v295_v5 = vpack.c.bf16 %v931_v3, %v931_v3  ;;  %p768_p13 = pneg %p767_p12  ;;  %s769_s20 = sshll.u32 %s832_s19, 4  ;;  %s770_s20 = int_to_ptr.vmem [resolvable:$false] %s769_s20 }
  0x1b   : > { %s771_s21 = scalar_lea.vmem %s770_s20, 512  ;;  %p772_p0 = scmp.lt.s32.totalorder %s992_s14, %s770_s20 }
  0x1c   : > { %699 = vmatprep.subr.msk.bf16.mxu1 %vm334_vm0, %v296_v4  ;;  %v336_v6 = vsel %vm334_vm0, %v295_v5, 0  ;;  %680 = vmatprep.subr.msk.bf16.mxu0 %vm334_vm0, %v296_v4  ;;  %p773_p1 = scmp.lt.s32.totalorder %s771_s21, %s765_s18 }
  0x1d   : > { %700 = vmatpush1.bf16.msra.mxu1 %v336_v6  ;;  %342 = vmatpush1.bf16.msra.mxu0 %v336_v6 }
  0x1e   : > { %694 = vmatprep.subr.mxu1 %v830_v41  ;;  %p774_p2 = por %p773_p1, %p772_p0 }
  0x20   : > { %682 = vmatmul.mubr.msk.bf16.vlgmr.msra.gmra.mrb[0].mxu1 %vm327_vm1, %v745_v7  ;;  %681 = vmatmul.mubr.msk.bf16.vlgmr.msra.gmra.mrb[0].mxu0 %vm327_vm1, %v746_v8  ;;  %p775_p3 = pnand %p774_p2, %p768_p13 }
  0x21   : > { %696 = vmatprep.mubr.msk.f32.mxu1 %vm831_vm4, %v830_v41 }
  0x8e   : > { %v315_v10 = vpop.permute.xlu0 %314 }
  0xf3   : > { %v385_v9 = vpop.f32.mrb[0].mxu1  ;;  %v375_v37 = vpop.f32.mrb[0].mxu0 }
  0xf4   : > { %v387_v11 = vpop.f32.mrb[1].mxu1  ;;  %v377_v38 = vpop.f32.mrb[1].mxu0 }
  0xf5   : > { %v389_v12 = vpop.f32.mrb[2].mxu1  ;;  %v955_v39 = vpop.f32.mrb[2].mxu0 }
  0xf6   : > { %v390_v13 = vadd.f32 %v389_v12, %v315_v10  ;;  %v391_v14 = vpop.f32.mrb[3].mxu1  ;;  %v957_v40 = vpop.f32.mrb[3].mxu0 }
  0xf7   : > { %v392_v15 = vadd.f32 %v391_v14, %v315_v10 }
  0xf8   : > { %v395_v16 = vsel %vm394_vm2, %v390_v13, -inf }
  0xf9   : > { %v396_v17 = vsel %vm394_vm2, %v392_v15, -inf }
  0xfa   : > { %v397_v18 = vmax.f32 %v395_v16, %v396_v17 }
  0xfc   : > { %398 = vmax.xlane.f32.xlu0 %v397_v18 }
 0x112   : > { %309 = vperm.xlu0 %743, %v284_v19  }
 0x189   : > { %v399_v20 = vpop.xlane.xlu0 %398 }
 0x18a   : > { %v400_v21 = vsub.f32 %v390_v13, %v399_v20  ;;  %v401_v22 = vsub.f32 %v392_v15, %v399_v20 }
 0x18c   : > { %v402_v23 = vmul.f32 1.442695, %v400_v21  ;;  %v404_v24 = vmul.f32 1.442695, %v401_v22 }
 0x18e   : > { %747 = vpow2.f32 %v402_v23 }
 0x18f   : > { %749 = vpow2.f32 %v404_v24 }
 0x191   : > { %v310_v25 = vpop.permute.xlu0 %309 }
 0x192   : > { %v386_v26 = vadd.f32 %v385_v9, %v310_v25  ;;  %v388_v27 = vadd.f32 %v387_v11, %v310_v25 }
 0x194   : > { %v536_v28 = vsel %vm424_vm3, %v386_v26, 0.0  ;;  %v537_v29 = vsel %vm424_vm3, %v388_v27, 0.0  ;;  %v288_v26 = vld [vmem:[%s1037_s5] sm:$0xff] }
 0x195   : > { %v538_v30 = vadd.f32 %v537_v29, %v536_v28  ;;  %v289_v28 = vld [vmem:[%s1038_s6] sm:$0xff] }
 0x197   : > { %539 = vadd.xlane.f32.xlu0 %v538_v30 }
 0x198   : > { %v748_v31 = vpop.eup %747 }
 0x199   : > { %v750_v32 = vpop.eup %749  ;;  %v406_v33 = vsel %vm394_vm2, %v748_v31, 0.0 }
 0x19a   : > { %v407_v34 = vsel %vm394_vm2, %v750_v32, 0.0 }
 0x19b   : > { %v408_v35 = vadd.f32 %v407_v34, %v406_v33 }
 0x19d   : > { %409 = vadd.xlane.f32.xlu1 %v408_v35 }
 0x1ae   : > { %299 = vperm.xlu1 %744, %v282_v36  }
 0x224   : > { %v540_v25 = vpop.xlane.xlu0 %539 }
 0x225   : > { %v542_v29 = vmul.f32 0.00390625, %v540_v25 }
 0x22a   : > { %v410_v42 = vpop.xlane.xlu1 %409 }
 0x22b   : > { %751 = vrcp.f32 %v410_v42 }
 0x22e   : > { %v300_v45 = vpop.permute.xlu1 %299 }
 0x22f   : > { %v376_v50 = vadd.f32 %v375_v37, %v300_v45  ;;  %v378_v51 = vadd.f32 %v377_v38, %v300_v45 }
 0x235   : > { %v752_v47 = vpop.eup %751 }
 0x236   : > { %v412_v48 = vmul.f32 %v752_v47, %v748_v31  ;;  %v413_v49 = vmul.f32 %v752_v47, %v750_v32  ;;  %v543_v32 = vsel %vm424_vm3, %v542_v29, -inf }
 0x237   : > { %v544_v34 = vrot.slane %v543_v32, 4 }
 0x238   : > { %v417_v52 = vrot.slane %v412_v48, %v416_v46  ;;  %v421_v53 = vrot.slane %v413_v49, %v416_v46 }
 0x239   : > { %v545_v35 = vmax.f32 %v543_v32, %v544_v34 }
 0x23a   : > { %v422_v54 = vmul.f32 %v417_v52, %v376_v50  ;;  %v423_v55 = vmul.f32 %v421_v53, %v378_v51 }
 0x23b   : > { %v546_v36 = vrot.slane %v545_v35, 2 }
 0x23c   : > { %v425_v56 = vsel %vm424_vm3, %v422_v54, 0.0  ;;  %v426_v57 = vsel %vm424_vm3, %v423_v55, 0.0 }
 0x23d   : > { %v427_v58 = vadd.f32 %v426_v57, %v425_v56  ;;  %v547_v41 = vmax.f32 %v545_v35, %v546_v36 }
 0x23f   : > { %428 = vadd.xlane.f32.xlu1 %v427_v58  ;;  %v548_v43 = vrot.slane %v547_v41, 1 }
 0x241   : > { %v549_v44 = vmax.f32 %v547_v41, %v548_v43 }
 0x243   : > { %v550_v45 = vsub.f32 %v542_v29, %v549_v44 }
 0x245   : > { %v551_v46 = vmul.f32 1.442695, %v550_v45 }
 0x250   : > { %304 = vperm.xlu1 %744, %v283_v59  }
 0x2cc   : > { %v429_v61 = vpop.xlane.xlu1 %428 }
 0x2cd   : > { %695 = vmatpush3.msk.msra.mxu1 %vm424_vm3, %v429_v61 }
 0x2ce   : > { %697 = vmatmul.mubr.msk.f32.vlgmr.msra.gmra.mrb[4].mxu1 %vm430_vm5, %v286_v60 }
 0x2d0   : > { %v305_v55 = vpop.permute.xlu1 %304 }
 0x2d1   : > { %v380_v57 = vadd.f32 %v955_v39, %v305_v55  ;;  %v382_v58 = vadd.f32 %v957_v40, %v305_v55 }
 0x3a1   : > { %v503_v63 = vpop.f32.mrb[4].mxu1 }
 0x3a2   : > { %v504_v0 = vadd.f32 %v503_v63, %v287_v62  ;;  %v698_v1 = vpop.f32.mrb[5].mxu1 }
 0x3a4   : > { %v508_v4 = vsel %vm507_vm6, %v504_v0, 0.0 }
 0x3a5   : > { %v509_v5 = vrot.slane %v508_v4, 4 }
 0x3a7   : > { %v510_v6 = vadd.f32 %v509_v5, %v508_v4 }
 0x3a9   : > { %v511_v7 = vrot.slane %v510_v6, 2 }
 0x3ab   : > { %v512_v8 = vadd.f32 %v511_v7, %v510_v6 }
 0x3ad   : > { %v513_v9 = vrot.slane %v512_v8, 1 }
 0x3af   : > { %v514_v10 = vadd.f32 %v513_v9, %v512_v8 }
 0x3b1   : > { %v515_v11 = vmul.f32 0.25, %v514_v10 }
 0x3b3   : > { %v516_v12 = vsub.f32 %v504_v0, %v515_v11 }
 0x3b5   : > { %v517_v13 = vsel %vm292_vm7, %v516_v12, 0.0 }
 0x3b6   : > { %v518_v14 = vmul.f32 %v517_v13, %v517_v13 }
 0x3b8   : > { %v519_v15 = vsel %vm507_vm6, %v518_v14, 0.0 }
 0x3b9   : > { %v520_v16 = vrot.slane %v519_v15, 4 }
 0x3bb   : > { %v521_v17 = vadd.f32 %v520_v16, %v519_v15 }
 0x3bd   : > { %v522_v18 = vrot.slane %v521_v17, 2 }
 0x3bf   : > { %v523_v19 = vadd.f32 %v522_v18, %v521_v17 }
 0x3c1   : > { %v524_v20 = vrot.slane %v523_v19, 1 }
 0x3c3   : > { %v525_v21 = vadd.f32 %v524_v20, %v523_v19 }
 0x3c5   : > { %v526_v22 = vmul.f32 0.25, %v525_v21 }
 0x3c7   : > { %v527_v23 = vadd.f32 1e-05, %v526_v22 }
 0x3c9   : > { %753 = vrsqrt.f32 %v527_v23 }
 0x3d3   : > { %v754_v24 = vpop.eup %753 }
 0x3d4   : > { %v529_v27 = vmul.f32 %v754_v24, %v516_v12 }
 0x3d6   : > { %v530_v30 = vmul.f32 %v529_v27, %v288_v26 }
 0x3d8   : > { %v531_v31 = vadd.f32 %v530_v30, %v289_v28 }
 0x3da   : > { %v532_v33 = vmul.f32 0.5, %v531_v31 }
 0x3dc   : > { %755 = vtanh.f32 %v532_v33 }
 0x3dd   : > { %757 = vpow2.f32 %v551_v46 }
 0x3e6   : > { %v756_v37 = vpop.eup %755 }
 0x3e7   : > { %v534_v38 = vadd.f32 1.0, %v756_v37  ;;  %v758_v47 = vpop.eup %757 }
 0x3e8   : > { %v553_v48 = vsel %vm424_vm3, %v758_v47, 0.0 }
 0x3e9   : > { %v535_v42 = vmul.f32 0.5, %v534_v38  ;;  %v554_v49 = vrot.slane %v553_v48, 4 }
 0x3eb   : > { %588 = vperm.xlu1 %744, %v535_v42   ;;  %v555_v50 = vadd.f32 %v554_v49, %v553_v48 }
 0x3ed   : > { %v556_v51 = vrot.slane %v555_v50, 2 }
 0x3ef   : > { %v557_v52 = vadd.f32 %v556_v51, %v555_v50 }
 0x3f1   : > { %v558_v53 = vrot.slane %v557_v52, 1 }
 0x3f3   : > { %v559_v54 = vadd.f32 %v558_v53, %v557_v52 }
 0x3f5   : > { %759 = vrcp.f32 %v559_v54 }
 0x3ff   : > { %v760_v56 = vpop.eup %759 }
 0x400   : > { %v561_v59 = vmul.f32 %v760_v56, %v758_v47 }
 0x402   : > { %v562_v60 = vmul.f32 %v561_v59, %v380_v57  ;;  %v563_v61 = vmul.f32 %v561_v59, %v382_v58 }
 0x404   : > { %v564_v62 = vsel %vm424_vm3, %v562_v60, 0.0  ;;  %v571_v63 = vsel %vm424_vm3, %v563_v61, 0.0 }
 0x405   : > { %v565_v0 = vrot.slane %v564_v62, 4  ;;  %v572_v1 = vrot.slane %v571_v63, 4 }
 0x407   : > { %v566_v4 = vadd.f32 %v565_v0, %v564_v62  ;;  %v573_v5 = vadd.f32 %v572_v1, %v571_v63 }
 0x409   : > { %v567_v6 = vrot.slane %v566_v4, 2  ;;  %v574_v7 = vrot.slane %v573_v5, 2 }
 0x40b   : > { %v568_v8 = vadd.f32 %v567_v6, %v566_v4  ;;  %v575_v9 = vadd.f32 %v574_v7, %v573_v5 }
 0x40d   : > { %v569_v10 = vrot.slane %v568_v8, 1  ;;  %v576_v39 = vrot.slane %v575_v9, 1 }
 0x40f   : > { %v570_v40 = vadd.f32 %v569_v10, %v568_v8  ;;  %v577_v11 = vadd.f32 %v576_v39, %v575_v9 }
 0x411   : > { %v578_v12 = vmul.f32 0.5, %v570_v40  ;;  %v579_v13 = vmul.f32 0.5, %v577_v11 }
 0x413   : > { %761 = vtanh.f32 %v578_v12 }
 0x414   : > { %763 = vtanh.f32 %v579_v13 }
 0x41d   : > { %v762_v14 = vpop.eup %761 }
 0x41e   : > { %v764_v15 = vpop.eup %763  ;;  %v582_v16 = vadd.f32 1.0, %v762_v14 }
 0x41f   : > { %v583_v17 = vadd.f32 1.0, %v764_v15 }
 0x420   : > { %v584_v18 = vmul.f32 0.5, %v582_v16 }
 0x421   : > { %v585_v19 = vmul.f32 0.5, %v583_v17 }
 0x46a   : > { %v589_v20 = vpop.permute.xlu1 %588 }
 0x46b   : > { %v591_v21 = vadd.f32 %v589_v20, %v584_v18  ;;  %v592_v22 = vadd.f32 %v589_v20, %v585_v19 }
 0x46d   : > { %v593_v23 = vmul.f32 %v591_v21, %v931_v3  ;;  %v594_v24 = vmul.f32 %v592_v22, %v929_v2 }
 0x46f   : > { %595 = vst [vmem:[%s271_s13] sm:$0xff] %v593_v23  ;;  %596 = vst [vmem:[%s271_s13 + $0x8] sm:$0xff] %v594_v24 }
 0x470   : > { %778 = shalt.err (!%p775_p3)
}
 0x471   : > { %s779_s22 = scalar_lea.hbm %s990_s17, 256  ;;  %s783_s8 = scalar_lea.hbm %s1039_s7, 512 }
 0x472   : > { %p780_p4 = scmp.ne.s32.totalorder %s990_s17, %s779_s22  ;;  %p784_p9 = scmp.lt.u32.totalorder %s990_s17, %s1039_s7 }
 0x473   : > { %p785_p10 = scmp.lt.u32.totalorder %s783_s8, %s779_s22  ;;  %p787_p12 = scmp.lt.u32.totalorder %s779_s22, %s990_s17 }
 0x474   : > { %p781_p7 = pnand %p780_p4, %p911_p5 }
 0x475   : > { %p786_p11 = por %p785_p10, %p784_p9 }
 0x476   : > { %p782_p8 = pneg %p781_p7 }
 0x477   : > { %p788_p13 = por %p787_p12, %p786_p11 }
 0x479   : > { %p789_p0 = pnand %p788_p13, %p782_p8 }
 0x47b   : > { %792 = shalt.err (!%p789_p0)
}
 0x47c   : > { %701 = dma.vmem_to_hbm [thread:$0]  (%p911_p5), %s992_s14, 256, %s990_s17, %s598_s28  }
 0x47d PF: > { %p707_p1 = scmp.ge.s32.totalorder %s827_s27, 2  ;;  %s624_s15 = sand.u32 1, %s815_s24  }
 0x47e   : > { %s625_s16 = scalar_lea.sflag [#allocation3], %s624_s15 }
 0x47f   : > { %p704_p2 = pnand %p707_p1, %p915_p6 }
 0x481   : > { %810 = dma.done.wait (!%p704_p2), %s625_s16, 256  }
 0x482   : > { %812 = vsyncadd (!%p704_p2), %s625_s16, 4294967040  ;;  %p17_p3 = scmp.ge.s32.totalorder %s898_s30, 4   ;;  %s1042_s24 = smov %s819_s25 }
 0x483   : > { %s1043_s25 = smov %s823_s26  ;;  %s1044_s26 = smov %s909_s10 }
 0x484   : > { %s1045_s27 = smov %s898_s30  ;;  %19 = sbr.rel (!%p17_p3) target bundleno = 3 (0x3), region = 83 }
 0x48b   :  { %630 = vsyncpa [#allocation3], 1 }
 0x48c   :  { %632 = vsyncpa [#allocation3 + $0x1], 1 }

</bundles_post_ra>
